<compile_context>
chip_gen: v6e
topology: v6e:2x2x1
jax: 0.10.0
libtpu: 0.0.40
codegen_flags: <defaults>
</compile_context>

<pallas_src>
import math
import numpy as np

import jax
import jax.numpy as jnp
from jax.experimental import pallas as pl
from jax.experimental.pallas import tpu as pltpu

_BN_EPS = 1e-5
_VMEM_LIMIT_BYTES = 48 * 1024 * 1024


def _pack_weights(params, cardinality):
    """Setup-time (host/numpy) weight repacking.

    1x1 convs -> (Cout, Cin) matrices, grouped 3x3 conv -> block-diagonal
    (width, 9*width) matrix pre-concatenated along the contraction axis,
    BN gamma/beta -> (C, 1) columns.  Matmul weights are cast to bf16.
    """
    conv1_w, g1, b1, conv2_w, g2, b2, conv3_w, g3, b3 = params
    width = conv1_w.shape[0]
    gc = width // cardinality

    w1 = jnp.asarray(conv1_w[:, :, 0, 0], dtype=jnp.bfloat16)          # (width, Cin)
    w3 = jnp.asarray(conv3_w[:, :, 0, 0], dtype=jnp.bfloat16)          # (Cout, width)

    # w2p[o, (ky*3+kx)*width + (g*gc + j)] = conv2_w[o, j, ky, kx], g = o // gc
    conv2_np = np.asarray(conv2_w, dtype=np.float32)                    # (width, gc, 3, 3)
    w2_np = np.zeros((width, 3, 3, width), np.float32)
    oo = np.arange(width)
    base = (oo // gc) * gc
    for j in range(gc):
        w2_np[oo, :, :, base + j] = conv2_np[oo, j, :, :]
    w2p = jnp.asarray(w2_np.reshape(width, 9 * width), dtype=jnp.bfloat16)

    def col(v):
        return jnp.asarray(v, jnp.float32).reshape(-1, 1)

    return w1, col(g1), col(b1), w2p, col(g2), col(b2), w3, col(g3), col(b3)


def _conv2_masks(H, W):
    """(9, H*W) 0/1 border masks for the 3x3 taps, flattened (h*W + w) order."""
    hh, ww = np.meshgrid(np.arange(H), np.arange(W), indexing="ij")
    m = np.zeros((9, H * W), np.float32)
    for ky in range(3):
        for kx in range(3):
            dy, dx = ky - 1, kx - 1
            valid = ((hh + dy >= 0) & (hh + dy < H) &
                     (ww + dx >= 0) & (ww + dx < W))
            m[ky * 3 + kx] = valid.reshape(-1).astype(np.float32)
    return jnp.asarray(m)


def resnext_bottleneck_forward(x_nchw, params, *, cardinality):
    """ResNeXt bottleneck forward (training-mode BN).

    x_nchw: (N, C_in, H, W) float32  ->  (N, C_out, H, W) float32.
    """
    N, Cin, H, W = x_nchw.shape
    width = params[0].shape[0]
    Cout = params[6].shape[0]
    # TODO(synk): stride > 1 / external downsample not implemented (identity residual).
    assert Cin == Cout, "identity residual requires in_planes == planes * 4"
    HW = H * W
    inv_cnt = 1.0 / float(N * HW)

    w1, g1, b1, w2p, g2, b2, w3, g3, b3 = _pack_weights(params, cardinality)
    masks = _conv2_masks(H, W)

    # Native NCHW, viewed per image as a channels-first (C, H*W) tile; the
    # reshape is free and no layout transpose is needed anywhere.
    x3 = x_nchw.reshape(N, Cin, HW)

    # ---------------- in-kernel helpers ----------------------------------
    def accum_stats(s_ref, h):
        # one fused reduction pass for per-channel sum and sum-of-squares
        part = jnp.sum(jnp.concatenate([h, h * h], axis=0), axis=1, keepdims=True)

        @pl.when(pl.program_id(0) == 0)
        def _():
            s_ref[...] = jnp.zeros_like(s_ref)

        s_ref[...] = s_ref[...] + part          # (2C,1) broadcast over lanes

    def bn_scale_shift(s_ref, g_ref, b_ref, c):
        # fold the completed global stats + gamma/beta into per-channel a, b
        s = s_ref[...][:, 0:1]                  # (2C, 1) = [sum; sum_sq]
        mean = s[:c] * inv_cnt
        var = s[c:] * inv_cnt - mean * mean
        a = g_ref[...] * jax.lax.rsqrt(var + _BN_EPS)
        return a, b_ref[...] - mean * a

    # ---------------- BlockSpec helpers -----------------------------------
    def img_block(c):   # per-image (C, HW) block of an (N, C, HW) array
        return pl.BlockSpec((None, c, HW), lambda n: (n, 0, 0))

    def whole(*shape):  # full array, resident across the grid
        return pl.BlockSpec(shape, lambda n: (0,) * len(shape))

    cp_acc = pltpu.CompilerParams(dimension_semantics=("arbitrary",),
                                  vmem_limit_bytes=_VMEM_LIMIT_BYTES)
    cp_par = pltpu.CompilerParams(dimension_semantics=("parallel",),
                                  vmem_limit_bytes=_VMEM_LIMIT_BYTES)

    # ---- pass 1: conv1 (1x1) + bn1 stats ----------------------------------
    def conv1_kernel(x_ref, w1_ref, h1_ref, s1_ref):
        h1 = jnp.dot(w1_ref[...], x_ref[...].astype(jnp.bfloat16),
                     preferred_element_type=jnp.float32)            # (width, HW) f32
        h1_ref[...] = h1
        accum_stats(s1_ref, h1)

    h1, s1 = pl.pallas_call(
        conv1_kernel,
        grid=(N,),
        in_specs=[img_block(Cin), whole(width, Cin)],
        out_specs=(img_block(width), whole(2 * width, 128)),
        out_shape=(jax.ShapeDtypeStruct((N, width, HW), jnp.float32),
                   jax.ShapeDtypeStruct((2 * width, 128), jnp.float32)),
        compiler_params=cp_acc,
    )(x3, w1)

    # ---- pass 2: bn1+relu, grouped 3x3 conv (one K=9*width matmul), bn2 stats
    PADW = W + 1  # zero margin for the largest flattened tap offset (W+1)

    def conv2_kernel(h1_ref, s1_ref, g1_ref, b1_ref, w2_ref, m_ref, h2_ref, s2_ref):
        a1, c1 = bn_scale_shift(s1_ref, g1_ref, b1_ref, width)
        y1 = jnp.maximum(h1_ref[...] * a1 + c1, 0.0)                # (width, HW) f32

        # im2col along the flattened H*W lane axis: 9 shifted views of y1,
        # zeroed outside the image by precomputed border masks, concatenated
        # along the contraction axis -> a single fused matmul.
        zpad = jnp.zeros((width, PADW), jnp.float32)
        ext = jnp.concatenate([zpad, y1, zpad], axis=1)             # (width, HW+2*PADW)
        m_all = m_ref[...]                                          # (9, HW)
        taps = []
        for ky in range(3):
            for kx in range(3):
                t = ky * 3 + kx
                off = PADW + (ky - 1) * W + (kx - 1)
                view = ext[:, off:off + HW]                         # (width, HW)
                mrow = m_all[t:t + 1, :]                            # (1, HW)
                taps.append((view * mrow).astype(jnp.bfloat16))
        patches = jnp.concatenate(taps, axis=0)                     # (9*width, HW) bf16

        h2 = jnp.dot(w2_ref[...], patches, preferred_element_type=jnp.float32)
        h2_ref[...] = h2
        accum_stats(s2_ref, h2)

    h2, s2 = pl.pallas_call(
        conv2_kernel,
        grid=(N,),
        in_specs=[img_block(width), whole(2 * width, 128),
                  whole(width, 1), whole(width, 1),
                  whole(width, 9 * width), whole(9, HW)],
        out_specs=(img_block(width), whole(2 * width, 128)),
        out_shape=(jax.ShapeDtypeStruct((N, width, HW), jnp.float32),
                   jax.ShapeDtypeStruct((2 * width, 128), jnp.float32)),
        compiler_params=cp_acc,
    )(h1, s1, g1, b1, w2p, masks)

    # ---- pass 3: bn2+relu, conv3 (1x1), bn3 stats --------------------------
    def conv3_kernel(h2_ref, s2_ref, g2_ref, b2_ref, w3_ref, h3_ref, s3_ref):
        a2, c2 = bn_scale_shift(s2_ref, g2_ref, b2_ref, width)
        y2 = jnp.maximum(h2_ref[...] * a2 + c2, 0.0).astype(jnp.bfloat16)
        h3 = jnp.dot(w3_ref[...], y2, preferred_element_type=jnp.float32)  # (Cout, HW)
        h3_ref[...] = h3
        accum_stats(s3_ref, h3)

    h3, s3 = pl.pallas_call(
        conv3_kernel,
        grid=(N,),
        in_specs=[img_block(width), whole(2 * width, 128),
                  whole(width, 1), whole(width, 1), whole(Cout, width)],
        out_specs=(img_block(Cout), whole(2 * Cout, 128)),
        out_shape=(jax.ShapeDtypeStruct((N, Cout, HW), jnp.float32),
                   jax.ShapeDtypeStruct((2 * Cout, 128), jnp.float32)),
        compiler_params=cp_acc,
    )(h2, s2, g2, b2, w3)

    # ---- pass 4: bn3 + residual add + relu (pure element-wise, parallel) ---
    def out_kernel(h3_ref, x_ref, s3_ref, g3_ref, b3_ref, o_ref):
        a3, c3 = bn_scale_shift(s3_ref, g3_ref, b3_ref, Cout)
        o_ref[...] = jnp.maximum(h3_ref[...] * a3 + c3 + x_ref[...], 0.0)

    out3 = pl.pallas_call(
        out_kernel,
        grid=(N,),
        in_specs=[img_block(Cout), img_block(Cin), whole(2 * Cout, 128),
                  whole(Cout, 1), whole(Cout, 1)],
        out_specs=img_block(Cout),
        out_shape=jax.ShapeDtypeStruct((N, Cout, HW), jnp.float32),
        compiler_params=cp_par,
    )(h3, x3, s3, g3, b3)

    return out3.reshape(N, Cout, H, W)


# ------------------------- pure-JAX reference (NCHW, f32) -------------------------
def _reference(x, params, *, cardinality):
    conv1_w, g1, b1, conv2_w, g2, b2, conv3_w, g3, b3 = params

    def conv(h, w, stride=1, padding=0, groups=1):
        return jax.lax.conv_general_dilated(
            h, w, window_strides=(stride, stride),
            padding=((padding, padding), (padding, padding)),
            dimension_numbers=("NCHW", "OIHW", "NCHW"),
            feature_group_count=groups)

    def bn(h, g, b):
        mean = jnp.mean(h, axis=(0, 2, 3), keepdims=True)
        var = jnp.mean((h - mean) ** 2, axis=(0, 2, 3), keepdims=True)
        return (h - mean) / jnp.sqrt(var + _BN_EPS) * g[None, :, None, None] \
            + b[None, :, None, None]

    out = jax.nn.relu(bn(conv(x, conv1_w), g1, b1))
    out = jax.nn.relu(bn(conv(out, conv2_w, padding=1, groups=cardinality), g2, b2))
    out = bn(conv(out, conv3_w), g3, b3)
    return jax.nn.relu(out + x)


if __name__ == "__main__":
    # Small shapes consistent with the module.
    N, H, W = 2, 8, 8
    planes, cardinality, baseWidth = 16, 8, 8
    width = int(math.floor(planes * cardinality * baseWidth / 64))   # = 16
    Cout = planes * 4                                                # = 64
    in_planes = Cout                                                 # identity residual

    key = jax.random.PRNGKey(0)
    ks = jax.random.split(key, 10)
    x = jax.random.normal(ks[0], (N, in_planes, H, W), jnp.float32)

    conv1_w = 0.1 * jax.random.normal(ks[1], (width, in_planes, 1, 1), jnp.float32)
    conv2_w = 0.1 * jax.random.normal(ks[2], (width, width // cardinality, 3, 3), jnp.float32)
    conv3_w = 0.1 * jax.random.normal(ks[3], (Cout, width, 1, 1), jnp.float32)
    g1 = jax.random.uniform(ks[4], (width,), minval=0.5, maxval=1.5)
    b1 = 0.1 * jax.random.normal(ks[5], (width,))
    g2 = jax.random.uniform(ks[6], (width,), minval=0.5, maxval=1.5)
    b2 = 0.1 * jax.random.normal(ks[7], (width,))
    g3 = jax.random.uniform(ks[8], (Cout,), minval=0.5, maxval=1.5)
    b3 = 0.1 * jax.random.normal(ks[9], (Cout,))

    params = (conv1_w, g1, b1, conv2_w, g2, b2, conv3_w, g3, b3)

    out = resnext_bottleneck_forward(x, params, cardinality=cardinality)
    out = jax.block_until_ready(out)

    ref = jax.block_until_ready(_reference(x, params, cardinality=cardinality))
    assert out.shape == ref.shape == (N, Cout, H, W)

    # Matmul inputs are bf16 (per the perf review), BN stats / accumulation in
    # f32 -> tolerance is looser than the previous all-f32 version.
    abs_err = jnp.abs(out - ref)
    max_err = float(jnp.max(abs_err))
    mean_err = float(jnp.mean(abs_err))
    assert max_err < 1e-1, f"max mismatch vs reference: {max_err}"
    assert mean_err < 1.5e-2, f"mean mismatch vs reference: {mean_err}"

    print("KERNEL_OK")
</pallas_src>

<mosaic_0001>
module attributes {stable_mosaic.version = 11 : i64} {
  func.func @conv1_kernel(%arg0: i32, %arg1: memref<1x64x64xf32, #tpu.memory_space<vmem>>, %arg2: memref<16x64xbf16, #tpu.memory_space<vmem>>, %arg3: memref<1x16x64xf32, #tpu.memory_space<vmem>>, %arg4: memref<32x128xf32, #tpu.memory_space<vmem>>) attributes {dimension_semantics = [#tpu.dimension_semantics<arbitrary>], iteration_bounds = array<i64: 2>, scalar_prefetch = 0 : i64, scratch_operands = 0 : i64, tpu.core_type = #tpu.core_type<tc>, window_params = [{transform_indices = @transform_0, window_bounds = array<i64: 1, 64, 64>}, {pipeline_mode = #tpu.pipeline_mode<synchronous>, transform_indices = @transform_1, window_bounds = array<i64: 16, 64>}, {transform_indices = @transform_2, window_bounds = array<i64: 1, 16, 64>}, {pipeline_mode = #tpu.pipeline_mode<synchronous>, transform_indices = @transform_3, window_bounds = array<i64: 32, 128>}]} {
    %c0 = arith.constant 0 : index
    %c0_0 = arith.constant 0 : index
    %0 = vector.load %arg2[%c0, %c0_0] : memref<16x64xbf16, #tpu.memory_space<vmem>>, vector<16x64xbf16>
    %c0_1 = arith.constant 0 : index
    %c0_2 = arith.constant 0 : index
    %c0_3 = arith.constant 0 : index
    %1 = vector.load %arg1[%c0_1, %c0_2, %c0_3] : memref<1x64x64xf32, #tpu.memory_space<vmem>>, vector<1x64x64xf32>
    %2 = vector.shape_cast %1 : vector<1x64x64xf32> to vector<64x64xf32>
    %3 = arith.truncf %2 : vector<64x64xf32> to vector<64x64xbf16>
    %cst = arith.constant dense<0.000000e+00> : vector<16x64xf32>
    %4 = tpu.matmul %0, %3, %cst {dimension_numbers = #tpu.dot_dimension_numbers<[1], [0], [0], [1], [0, 0, 1, 1], [], []>} : vector<16x64xbf16>, vector<64x64xbf16>, vector<16x64xf32> -> vector<16x64xf32>
    %c0_4 = arith.constant 0 : index
    %c0_5 = arith.constant 0 : index
    %c0_6 = arith.constant 0 : index
    %5 = vector.load %arg3[%c0_4, %c0_5, %c0_6] : memref<1x16x64xf32, #tpu.memory_space<vmem>>, vector<1x16x64xf32>
    %6 = vector.shape_cast %5 : vector<1x16x64xf32> to vector<16x64xf32>
    %7 = vector.shape_cast %4 : vector<16x64xf32> to vector<1x16x64xf32>
    tpu.vector_store %arg3[%c0_4, %c0_5, %c0_6], %7 {strides = array<i32>} : memref<1x16x64xf32, #tpu.memory_space<vmem>>, vector<1x16x64xf32>,
    %8 = arith.mulf %4, %4 : vector<16x64xf32>
    %9 = tpu.concatenate %4, %8 in 0 : vector<16x64xf32>, vector<16x64xf32> -> vector<32x64xf32>
    %cst_7 = arith.constant dense<0.000000e+00> : vector<32xf32>
    %10 = vector.multi_reduction <add>, %9, %cst_7 [1] : vector<32x64xf32> to vector<32xf32>
    %11 = vector.shape_cast %10 : vector<32xf32> to vector<32x1xf32>
    %c0_i32 = arith.constant 0 : i32
    %12 = arith.cmpi eq, %arg0, %c0_i32 : i32
    %13 = arith.extui %12 : i1 to i32
    %c0_i32_8 = arith.constant 0 : i32
    %14 = arith.cmpi ne, %13, %c0_i32_8 : i32
    scf.if %14 {
      %cst_13 = arith.constant 0.000000e+00 : f32
      %19 = vector.broadcast %cst_13 : f32 to vector<32x128xf32>
      %c0_14 = arith.constant 0 : index
      %c0_15 = arith.constant 0 : index
      %20 = vector.load %arg4[%c0_14, %c0_15] : memref<32x128xf32, #tpu.memory_space<vmem>>, vector<32x128xf32>
      tpu.vector_store %arg4[%c0_14, %c0_15], %19 {strides = array<i32>} : memref<32x128xf32, #tpu.memory_space<vmem>>, vector<32x128xf32>,
    } else {
    }
    %c0_9 = arith.constant 0 : index
    %c0_10 = arith.constant 0 : index
    %15 = vector.load %arg4[%c0_9, %c0_10] : memref<32x128xf32, #tpu.memory_space<vmem>>, vector<32x128xf32>
    %16 = vector.broadcast %11 : vector<32x1xf32> to vector<32x128xf32>
    %17 = arith.addf %15, %16 : vector<32x128xf32>
    %c0_11 = arith.constant 0 : index
    %c0_12 = arith.constant 0 : index
    %18 = vector.load %arg4[%c0_11, %c0_12] : memref<32x128xf32, #tpu.memory_space<vmem>>, vector<32x128xf32>
    tpu.vector_store %arg4[%c0_11, %c0_12], %17 {strides = array<i32>} : memref<32x128xf32, #tpu.memory_space<vmem>>, vector<32x128xf32>,
    return
  }
  func.func @transform_0(%arg0: i32) -> (i32, i32, i32) {
    %c0_i32 = arith.constant 0 : i32
    %c0_i32_0 = arith.constant 0 : i32
    %c0_i32_1 = arith.constant 0 : i32
    return %arg0, %c0_i32, %c0_i32_0 : i32, i32, i32
  }
  func.func @transform_1(%arg0: i32) -> (i32, i32) {
    %c0_i32 = arith.constant 0 : i32
    %c0_i32_0 = arith.constant 0 : i32
    %c0_i32_1 = arith.constant 0 : i32
    return %c0_i32, %c0_i32_0 : i32, i32
  }
  func.func @transform_2(%arg0: i32) -> (i32, i32, i32) {
    %c0_i32 = arith.constant 0 : i32
    %c0_i32_0 = arith.constant 0 : i32
    %c0_i32_1 = arith.constant 0 : i32
    return %arg0, %c0_i32, %c0_i32_0 : i32, i32, i32
  }
  func.func @transform_3(%arg0: i32) -> (i32, i32) {
    %c0_i32 = arith.constant 0 : i32
    %c0_i32_0 = arith.constant 0 : i32
    %c0_i32_1 = arith.constant 0 : i32
    return %c0_i32, %c0_i32_0 : i32, i32
  }
}

</mosaic_0001>

<bundles_post_ra>
// kernel: tpu_custom_call.1
= control target key start
LH: loop header
LB: loop body
LE: loop exit
PB: predicated region body
PF: predicated region fallthrough
CT: control target
= control target key end

     0   :  { %9 = vsyncpa [#allocation3], 0  ;;  %s928_s0 = inlined_call_operand.hbm [shape: f32[2,64,64], index: 0, kind: input, shape index: {}]   ;;  %s929_s1 = inlined_call_operand.hbm [shape: bf16[16,64], index: 1, kind: input, shape index: {}]   ;;  %s930_s2 = inlined_call_operand.hbm [shape: f32[2,16,64], index: 2, kind: output, shape index: {0}]   ;;  %s931_s3 = inlined_call_operand.hbm [shape: f32[32,128], index: 3, kind: output, shape index: {1}]  }
   0x1   :  { %11 = vsyncpa [#allocation3 + $0x1], 0 }
   0x2   :  { %12 = vsyncpa [#allocation6], 0 }
   0x3   :  { %13 = vsyncpa [#allocation4], 0 }
   0x4   :  { %15 = vsyncpa [#allocation4 + $0x1], 0 }
   0x5   :  { %16 = vsyncpa [#allocation9], 0  ;;  %s724_s12 = smov 0   ;;  %s726_s13 = smov 0  }
   0x6   :  { %s728_s14 = smov 0   ;;  %s730_s15 = smov 0  }
   0x7 LB: > { %s745_s16 = sadd.s32 4294967295, %s689_s15   ;;  %s425_s17 = sadd.s32 4294967294, %s689_s15   ;;  %s689_s15 = sphi %s730_s15, %s958_s15   ;;  %s685_s14 = sphi %s728_s14, %s957_s14   ;;  %s681_s13 = sphi %s726_s13, %s956_s13   ;;  %s677_s12 = sphi %s724_s12, %s955_s12  }
   0x8   : > { %p42_p0 = scmp.ne.s32.totalorder %s681_s13, %s677_s12  ;;  %p932_p1 = scmp.eq.s32.totalorder %s745_s16, 0 }
   0x9   : > { %p93_p3 = scmp.eq.s32.totalorder %s425_s17, 1  ;;  %p426_p5 = scmp.ge.s32.totalorder %s689_s15, 1 }
   0xa   : > { %p754_p4 = por %p932_p1, %p42_p0  ;;  %p121_p7 = scmp.lt.s32.totalorder %s689_s15, 3 }
   0xb   : > { %p759_p6 = por %p93_p3, %p42_p0  ;;  %s691_s21 = smov [#allocation5]  }
   0xc   : > { %s936_s18 = scalar_select %p754_p4, 1, 0 }
   0xd   : > { %s937_s19 = scalar_select %p759_p6, 1, 0 }
   0xe   : > { %p765_p9 = pnand %p426_p5, %p121_p7  ;;  %s133_s22 = sshll.u32 %s691_s21, 4  ;;  %s134_s22 = int_to_ptr.vmem [resolvable:$true] %s133_s22 }
   0xf   : > { %s779_s24 = sadd.s32 1, %s689_s15   ;;  %s29_s25 = sadd.s32 1, %s685_s14 }
  0x10   : > { %s938_s20 = scalar_select %p765_p9, 1, 0 }
  0x11   : > { %p477_p10 = pneg %p765_p9  ;;  %s26_s26 = ssub.s32 %s689_s15, %s779_s24 }
  0x12   : > { %s550_s27 = scalar_lea.vmem %s134_s22, 128  ;;  %p558_p7 = scmp.lt.s32.totalorder %s134_s22, %s134_s22 }
  0x13   : > { %p774_p12 = pnand %p477_p10, %p932_p1  ;;  %p551_p0 = scmp.ne.s32.totalorder %s134_s22, %s550_s27 }
  0x14   : > { %p559_p8 = scmp.lt.s32.totalorder %s550_s27, %s550_s27 }
  0x15   : > { %p541_p13 = pneg %p774_p12 }
  0x16   : > { %p560_p11 = por %p559_p8, %p558_p7 }
  0x17   : > { %p553_p3 = pnand %p551_p0, %p541_p13 }
  0x19   : > { %p554_p5 = pneg %p553_p3 }
  0x1b   : > { %p561_p2 = pnand %p560_p11, %p554_p5 }
  0x1d   : > { %564 = shalt.err (!%p561_p2)
}
  0x1e   : > { %s692_s28 = smov 64   ;;  %s693_s29 = smov 4  }
  0x1f   : > { %480 = dma.hbm_to_vmem [thread:$0]  (!%p774_p12), %s929_s1, 128, %s134_s22, [#allocation6], %s692_s28, %s692_s28, %s693_s29  }
  0x20   : > { %p27_p10 = scmp.eq.s32.totalorder %s26_s26, 0  ;;  %p36_p8 = scmp.ne.s32.totalorder %s685_s14, %s681_s13 }
  0x21   : > { %p37_p11 = scmp.eq.s32.totalorder %s689_s15, 0  ;;  %p490_p2 = scmp.lt.s32.totalorder %s689_s15, 2 }
  0x22   : > { %s796_s5 = scalar_select %p27_p10, %s685_s14, %s29_s25  }
  0x23   : > { %p38_p13 = por %p37_p11, %p36_p8  ;;  %p940_p0 = scmp.eq.s32.totalorder %s745_s16, 1 }
  0x24   : > { %s147_s7 = sand.u32 1, %s685_s14   ;;  %s446_s8 = sshll.u32 %s689_s15, 10 }
  0x25   : > { %p800_p3 = por %p940_p0, %p36_p8  ;;  %s429_s9 = sshll.u32 %s147_s7, 6 }
  0x26   : > { %s809_s17 = scalar_lea.hbm %s928_s0, %s446_s8  ;;  %s151_s21 = scalar_lea.vmem [#allocation2], %s429_s9 }
  0x27   : > { %s941_s6 = scalar_select %p800_p3, 1, 0 }
  0x28   : > { %s158_s22 = sshll.u32 %s151_s21, 4  ;;  %p811_p12 = pnand %p490_p2, %p38_p13  ;;  %s815_s22 = int_to_ptr.vmem [resolvable:$true] %s158_s22 }
  0x29   : > { %s817_s25 = scalar_lea.sflag [#allocation3], %s147_s7  ;;  %s565_s26 = scalar_lea.hbm %s809_s17, 1024 }
  0x2a   : > { %p566_p5 = scmp.ne.s32.totalorder %s809_s17, %s565_s26  ;;  %p567_p7 = pneg %p811_p12 }
  0x2b   : > { %s570_s29 = scalar_lea.hbm %s928_s0, 2048  ;;  %p571_p11 = scmp.lt.s32.totalorder %s809_s17, %s928_s0 }
  0x2c   : > { %p568_p10 = pnand %p567_p7, %p566_p5  ;;  %p572_p2 = scmp.lt.s32.totalorder %s570_s29, %s565_s26 }
  0x2e   : > { %p569_p8 = pneg %p568_p10  ;;  %p573_p13 = por %p572_p2, %p571_p11 }
  0x30   : > { %p574_p0 = pnand %p573_p13, %p569_p8 }
  0x32   : > { %577 = shalt.err (!%p574_p0)
}
  0x33   : > { %s578_s7 = scalar_lea.vmem %s815_s22, 1024  ;;  %s694_s8 = smov [#allocation2]  }
  0x34   : > { %p579_p1 = scmp.ne.s32.totalorder %s815_s22, %s578_s7  ;;  %s583_s9 = sshll.u32 %s694_s8, 4  ;;  %s584_s9 = int_to_ptr.vmem [resolvable:$false] %s583_s9 }
  0x35   : > { %s585_s10 = scalar_lea.vmem %s584_s9, 2048  ;;  %p586_p10 = scmp.lt.s32.totalorder %s815_s22, %s584_s9 }
  0x36   : > { %p581_p6 = pnand %p579_p1, %p567_p7  ;;  %p587_p3 = scmp.lt.s32.totalorder %s585_s10, %s578_s7 }
  0x38   : > { %p582_p5 = pneg %p581_p6  ;;  %p588_p4 = por %p587_p3, %p586_p10 }
  0x3a   : > { %p589_p9 = pnand %p588_p4, %p582_p5 }
  0x3c   : > { %592 = shalt.err (!%p589_p9)
}
  0x3d   : > { %s695_s11 = smov 128   ;;  %s696_s21 = smov 8  }
  0x3e   : > { %484 = dma.hbm_to_vmem [thread:$0]  (!%p811_p12), %s809_s17, 1024, %s815_s22, %s817_s25, %s695_s11, %s695_s11, %s696_s21  }
  0x3f   : > { %p943_p1 = scmp.ne.s32.totalorder %s938_s20, 0 }
  0x40   : > { %s841_s26 = sand.u32 (!%p943_p1), 1, %s681_s13   ;;  %p944_p4 = scmp.ne.s32.totalorder (!%p943_p1), %s936_s18, 0 }
  0x41   : > { %170 = sbr.rel (%p943_p1) target bundleno = 477 (0x1dd), region = 28  ;;  %s433_s27 = sshll.u32 (!%p943_p1), %s841_s26, 6 }
  0x42   : > { %s173_s28 = scalar_lea.sflag (!%p943_p1), [#allocation3], %s841_s26  ;;  %s176_s29 = scalar_lea.vmem (!%p943_p1), [#allocation2], %s433_s27 }
  0x46   : > { %660 = dma.done.wait (%p944_p4), %s173_s28, 1024  }
  0x47   : > { %662 = vsyncadd (%p944_p4), %s173_s28, 4294966272  ;;  %p945_p6 = scmp.eq.s32.totalorder %s745_s16, 0 }
  0x49   : > { %664 = dma.done.wait (%p945_p6), [#allocation6], 128   ;;  %p946_p9 = pmov %p945_p6 }
  0x4a   : > { %v697_v0 = vmov 0.0   ;;  %vm698_vm0 = vmmov 0   ;;  %v212_v1 = vld [vmem:[%s176_s29 + $0x30] sm:$0xff]  ;;  %v213_v2 = vld [vmem:[%s176_s29 + $0x38] sm:$0xff]  ;;  %v210_v3 = vld [vmem:[%s176_s29 + $0x20] sm:$0xff]  ;;  %vm223_vm1 = vcmask 523264  }
  0x4b   : > { %666 = vsyncadd (%p946_p9), [#allocation6], 4294967168  ;;  %453 = vmatprep.subr.bf16.mxu0 %v697_v0  ;;  %461 = vmatprep.mubr.msk.bf16.mxu0 %vm698_vm0, %v697_v0  ;;  %v217_v4 = vpack.c.bf16 %v213_v2, %v212_v1  ;;  %v211_v5 = vld [vmem:[%s176_s29 + $0x28] sm:$0xff]  ;;  %v208_v7 = vld [vmem:[%s176_s29 + $0x10] sm:$0xff]  ;;  %s435_s18 = sshll.u32 %s841_s26, 4  ;;  %p947_p3 = scmp.ne.s32.totalorder %s745_s16, 0 }
  0x4c   : > { %v216_v6 = vpack.c.bf16 %v211_v5, %v210_v3  ;;  %v209_v8 = vld [vmem:[%s176_s29 + $0x18] sm:$0xff]  ;;  %v206_v10 = vld [vmem:[%s176_s29] sm:$0xff]  ;;  %v207_v11 = vld [vmem:[%s176_s29 + $0x8] sm:$0xff]  ;;  %s855_s20 = scalar_lea.vmem [#allocation7], %s435_s18 }
  0x4d   : > { %454 = vmatpush3.bf16.msra.mxu0 %v217_v4  ;;  %v215_v9 = vpack.c.bf16 %v209_v8, %v208_v7  ;;  %v214_v12 = vpack.c.bf16 %v207_v11, %v206_v10  ;;  %v538_v13 = vld [vmem:[#allocation5] sm:$0xff]  }
  0x4e   : > { %455 = vmatprep.subr.bf16.mxu0 %v697_v0 }
  0x51   : > { %456 = vmatpush3.bf16.msra.mxu0 %v216_v6 }
  0x52   : > { %457 = vmatprep.subr.bf16.mxu0 %v697_v0 }
  0x55   : > { %458 = vmatpush3.bf16.msra.mxu0 %v215_v9 }
  0x56   : > { %459 = vmatprep.subr.bf16.mxu0 %v697_v0 }
  0x59   : > { %460 = vmatpush3.bf16.msra.mxu0 %v214_v12 }
  0x5c   : > { %462 = vmatmul.mubr.msk.bf16.vlgmr.msra.gmra.mxu0 %vm223_vm1, %v538_v13 }
 0x11c   : > { %v261_v14 = vpop.f32.mrf.mxu0 }
 0x11d   : > { %268 = vst.msk [vmem:[%s855_s20] sm:$0xff] %vm223_vm1, %v261_v14  ;;  %v272_v15 = vsel %vm223_vm1, %v261_v14, 0.0  ;;  %v270_v16 = vmul.f32 %v261_v14, %v261_v14 }
 0x11e   : > { %273 = vadd.xlane.f32.xlu0 %v272_v15  ;;  %v463_v17 = vpop.f32.mrf.mxu0 }
 0x11f   : > { %v278_v18 = vsel %vm223_vm1, %v270_v16, 0.0 }
 0x120   : > { %279 = vadd.xlane.f32.xlu1 %v278_v18  ;;  %v264_v19 = vpop.f32.mrf.mxu0 }
 0x121   : > { %269 = vst.msk [vmem:[%s855_s20 + $0x8] sm:$0xff] %vm223_vm1, %v264_v19  ;;  %v275_v20 = vsel %vm223_vm1, %v264_v19, 0.0  ;;  %v271_v21 = vmul.f32 %v264_v19, %v264_v19 }
 0x122   : > { %276 = vadd.xlane.f32.xlu0 %v275_v20  ;;  %v464_v22 = vpop.f32.mrf.mxu0 }
 0x123   : > { %v281_v23 = vsel %vm223_vm1, %v271_v21, 0.0 }
 0x124   : > { %282 = vadd.xlane.f32.xlu1 %v281_v23 }
 0x1a7   : > { %v274_v24 = vpop.xlane.xlu0 %273 }
 0x1a9   : > { %v280_v25 = vpop.xlane.xlu1 %279  ;;  %287 = sbr.rel (%p947_p3) target bundleno = 433 (0x1b1), region = 40 }
 0x1ab   : > { %v277_v26 = vpop.xlane.xlu0 %276 }
 0x1ad   : > { %v283_v27 = vpop.xlane.xlu1 %282 }
 0x1ae   : > { %v699_v28 = vmov 0.0  }
 0x1af   : > { %288 = vst [vmem:[#allocation8] sm:$0xff] %v699_v28  ;;  %289 = vst [vmem:[#allocation8 + $0x8] sm:$0xff] %v699_v28 }
 0x1b0   : > { %290 = vst [vmem:[#allocation8 + $0x10] sm:$0xff] %v699_v28  ;;  %291 = vst [vmem:[#allocation8 + $0x18] sm:$0xff] %v699_v28 }
 0x1b1 PF: > { %s447_s17 = sshll.u32 %s745_s16, 8  ;;  %s318_s30 = sshll.u32 %s855_s20, 4  ;;  %s874_s30 = int_to_ptr.vmem [resolvable:$true] %s318_s30 }
 0x1b2   : > { %s871_s25 = scalar_lea.hbm %s930_s2, %s447_s17  ;;  %s305_s4 = scalar_lea.sflag [#allocation4], %s841_s26 }
 0x1b3   : > { %s593_s7 = scalar_lea.vmem %s874_s30, 256  ;;  %p948_p7 = scmp.ne.s32.totalorder %s941_s6, 0 }
 0x1b4   : > { %p594_p12 = scmp.ne.s32.totalorder %s874_s30, %s593_s7  ;;  %s700_s8 = smov [#allocation7]  }
 0x1b5   : > { %s597_s9 = sshll.u32 %s700_s8, 4  ;;  %s598_s9 = int_to_ptr.vmem [resolvable:$false] %s597_s9 }
 0x1b6   : > { %v292_v29 = vld [vmem:[#allocation8] sm:$0xff]  ;;  %v293_v30 = vld [vmem:[#allocation8 + $0x8] sm:$0xff]  ;;  %p595_p8 = pnand %p594_p12, %p948_p7  ;;  %s599_s10 = scalar_lea.vmem %s598_s9, 512 }
 0x1b7   : > { %v294_v31 = vld [vmem:[#allocation8 + $0x10] sm:$0xff]  ;;  %v296_v32 = vadd.f32 %v292_v29, %v274_v24  ;;  %v297_v33 = vadd.f32 %v293_v30, %v277_v26  ;;  %v295_v35 = vld [vmem:[#allocation8 + $0x18] sm:$0xff]  ;;  %p600_p2 = scmp.lt.s32.totalorder %s874_s30, %s598_s9  ;;  %p601_p13 = scmp.lt.s32.totalorder %s599_s10, %s593_s7 }
 0x1b8   : > { %v298_v34 = vadd.f32 %v294_v31, %v280_v25  ;;  %v299_v36 = vadd.f32 %v295_v35, %v283_v27  ;;  %p596_p11 = pneg %p595_p8 }
 0x1b9   : > { %300 = vst [vmem:[#allocation8] sm:$0xff] %v296_v32  ;;  %301 = vst [vmem:[#allocation8 + $0x8] sm:$0xff] %v297_v33  ;;  %p602_p0 = por %p601_p13, %p600_p2 }
 0x1ba   : > { %302 = vst [vmem:[#allocation8 + $0x10] sm:$0xff] %v298_v34  ;;  %303 = vst [vmem:[#allocation8 + $0x18] sm:$0xff] %v299_v36 }
 0x1bb   : > { %p603_p5 = pnand %p602_p0, %p596_p11 }
 0x1bd   : > { %606 = shalt.err (!%p603_p5)
}
 0x1be   : > { %s607_s11 = scalar_lea.hbm %s871_s25, 256  ;;  %s611_s28 = scalar_lea.hbm %s930_s2, 512 }
 0x1bf   : > { %p608_p10 = scmp.ne.s32.totalorder %s871_s25, %s607_s11  ;;  %p612_p6 = scmp.lt.s32.totalorder %s871_s25, %s930_s2 }
 0x1c0   : > { %p613_p9 = scmp.lt.s32.totalorder %s611_s28, %s607_s11 }
 0x1c1   : > { %p609_p1 = pnand %p608_p10, %p948_p7 }
 0x1c2   : > { %p614_p3 = por %p613_p9, %p612_p6 }
 0x1c3   : > { %p610_p4 = pneg %p609_p1 }
 0x1c5   : > { %p615_p12 = pnand %p614_p3, %p610_p4 }
 0x1c7   : > { %618 = shalt.err (!%p615_p12)
}
 0x1c8   : > { %s701_s20 = smov 128   ;;  %s702_s17 = smov 8  }
 0x1c9   : > { %471 = dma.vmem_to_hbm [thread:$0]  (%p948_p7), %s874_s30, 256, %s871_s25, %s305_s4, %s701_s20, %s701_s20, %s702_s17  }
 0x1ca   : > { %s703_s22 = smov [#allocation8]   ;;  %p949_p11 = scmp.eq.s32.totalorder %s745_s16, 1 }
 0x1cb   : > { %s331_s23 = sshll.u32 %s703_s22, 4  ;;  %s332_s23 = int_to_ptr.vmem [resolvable:$true] %s331_s23 }
 0x1cc   : > { %s619_s7 = scalar_lea.vmem %s332_s23, 512  ;;  %p626_p0 = scmp.lt.s32.totalorder %s332_s23, %s332_s23 }
 0x1cd   : > { %p620_p8 = scmp.ne.s32.totalorder %s332_s23, %s619_s7  ;;  %p627_p5 = scmp.lt.s32.totalorder %s619_s7, %s619_s7 }
 0x1cf   : > { %p621_p2 = pnand %p620_p8, %p949_p11  ;;  %p628_p10 = por %p627_p5, %p626_p0 }
 0x1d1   : > { %p622_p13 = pneg %p621_p2 }
 0x1d3   : > { %p629_p1 = pnand %p628_p10, %p622_p13 }
 0x1d5   : > { %632 = shalt.err (!%p629_p1)
}
 0x1d6   : > { %p950_p4 = pmov %p949_p11 }
 0x1d8   : > { %473 = dma.vmem_to_hbm [thread:$0]  (%p950_p4), %s332_s23, 512, %s931_s3, [#allocation9], %s701_s20, %s701_s20, %s702_s17  }
 0x1d9   : > { %p951_p7 = pmov %p950_p4 }
 0x1da   : > { %p952_p6 = pmov %p950_p4 }
 0x1db   : > { %668 = dma.done.wait (%p951_p7), [#allocation9], 512  }
 0x1dc   : > { %670 = vsyncadd (%p952_p6), [#allocation9], 4294966784 }
 0x1dd PF: > { %s350_s6 = sand.u32 1, %s677_s12   ;;  %p953_p9 = scmp.ne.s32.totalorder %s937_s19, 0 }
 0x1de   : > { %p954_p3 = scmp.ge.s32.totalorder %s689_s15, 2  ;;  %s351_s26 = scalar_lea.sflag [#allocation4], %s350_s6 }
 0x1e0   : > { %p486_p12 = pnand %p954_p3, %p953_p9 }
 0x1e2   : > { %p487_p8 = pneg %p486_p12 }
 0x1e4   : > { %672 = dma.done.wait (%p487_p8), %s351_s26, 256  }
 0x1e5   : > { %674 = vsyncadd (%p487_p8), %s351_s26, 4294967040  ;;  %p19_p11 = scmp.ge.s32.totalorder %s779_s24, 4   ;;  %s955_s12 = smov %s681_s13 }
 0x1e6   : > { %s956_s13 = smov %s685_s14  ;;  %s957_s14 = smov %s796_s5 }
 0x1e7   : > { %s958_s15 = smov %s779_s24  ;;  %21 = sbr.rel (!%p19_p11) target bundleno = 7 (0x7), region = 89 }
 0x1ec   :  { %356 = vsyncpa [#allocation3], 1 }
 0x1ed   :  { %358 = vsyncpa [#allocation3 + $0x1], 1 }
 0x1ee   :  { %359 = vsyncpa [#allocation6], 1 }
 0x1ef   :  { %360 = vsyncpa [#allocation4], 1 }
 0x1f0   :  { %362 = vsyncpa [#allocation4 + $0x1], 1 }
 0x1f1   :  { %363 = vsyncpa [#allocation9], 1 }

</bundles_post_ra>
